<compile_context>
chip_gen: v6e
topology: v6e:2x2x1
jax: 0.10.0
libtpu: 0.0.40
codegen_flags: <defaults>
</compile_context>

<pallas_src>
import math

import jax
import jax.numpy as jnp
from jax import lax
from jax.experimental import pallas as pl
from jax.experimental.pallas import tpu as pltpu

HEAD_DIM = 16
# Large negative finite value: exp(MASK - rowmax) underflows to exactly 0 in f32,
# matching the -inf masked_fill semantics while staying NaN-safe.
MASK_VALUE = -1e30


def _attention_kernel(x_q_ref, x_kv_ref, wq_ref, wkv_ref, o_ref,
                      q_sc, m_sc, l_sc, acc_sc):
    # x_q_ref:  (TQ, D)   query rows of the current batch element
    # x_kv_ref: (TK, D)   key/value rows of the current batch element
    # wq_ref:   (D, 16)   query projection (scale pre-folded)
    # wkv_ref:  (D, 32)   fused [Wk | Wv] projection
    # o_ref:    (TQ, 16)
    tq = x_q_ref.shape[0]
    tk = x_kv_ref.shape[0]

    qi = pl.program_id(1)
    ki = pl.program_id(2)
    nk = pl.num_programs(2)

    q_first = qi * tq
    q_last = q_first + (tq - 1)
    k_first = ki * tk
    k_last = k_first + (tk - 1)

    @pl.when(ki == 0)
    def _init():
        # Q projection computed once per (batch, query-tile); reused over all KV tiles.
        q_sc[...] = jnp.dot(x_q_ref[...], wq_ref[...],
                            preferred_element_type=jnp.float32)
        m_sc[...] = jnp.full(m_sc.shape, -jnp.inf, jnp.float32)
        l_sc[...] = jnp.zeros(l_sc.shape, jnp.float32)
        acc_sc[...] = jnp.zeros(acc_sc.shape, jnp.float32)

    # Causal tiling predicates (computed on the scalar unit).
    needs_compute = k_first <= q_last   # some key in this tile is visible
    crosses_diag = k_last > q_first     # some key in this tile must be masked

    def _update(apply_mask):
        # Fused K/V projection: single (TK, D) @ (D, 32) matmul, then split.
        kv = jnp.dot(x_kv_ref[...], wkv_ref[...],
                     preferred_element_type=jnp.float32)        # (TK, 32)
        k = kv[:, :HEAD_DIM]
        v = kv[:, HEAD_DIM:]

        # q @ k^T contracting the last dims — no explicit transpose of k.
        s = lax.dot_general(q_sc[...], k, (((1,), (1,)), ((), ())),
                            preferred_element_type=jnp.float32)  # (TQ, TK)

        if apply_mask:  # only on tiles that cross the causal diagonal
            rows = q_first + lax.broadcasted_iota(jnp.int32, (tq, tk), 0)
            cols = k_first + lax.broadcasted_iota(jnp.int32, (tq, tk), 1)
            s = jnp.where(cols <= rows, s, MASK_VALUE)

        # Online (streaming) softmax update.
        m_prev = m_sc[...]
        m_new = jnp.maximum(m_prev, jnp.max(s, axis=-1, keepdims=True))
        alpha = jnp.exp(m_prev - m_new)
        p = jnp.exp(s - m_new)
        l_sc[...] = alpha * l_sc[...] + jnp.sum(p, axis=-1, keepdims=True)
        acc_sc[...] = alpha * acc_sc[...] + jnp.dot(
            p, v, preferred_element_type=jnp.float32)
        m_sc[...] = m_new

    @pl.when(needs_compute & crosses_diag)
    def _masked_tile():
        _update(apply_mask=True)

    @pl.when(needs_compute & jnp.logical_not(crosses_diag))
    def _unmasked_tile():
        _update(apply_mask=False)

    @pl.when(ki == nk - 1)
    def _finalize():
        o_ref[...] = (acc_sc[...] *
                      pl.reciprocal(l_sc[...], approx=False)).astype(o_ref.dtype)


def _choose_tile(s, target):
    """Largest multiple-of-8 divisor of s that is <= target (or s itself)."""
    if s <= target:
        return s
    t = (min(target, s) // 8) * 8
    while t >= 8:
        if s % t == 0:
            return t
        t -= 8
    return s  # fall back to a single untiled block


def attention_pallas(x, wq, wk, wv, *, q_tile=256, kv_tile=256):
    """x: (B, S, D) f32; wq/wk/wv: (D, 16) f32 -> (B, S, 16) f32."""
    B, S, D = x.shape
    tq = _choose_tile(S, q_tile)
    tk = _choose_tile(S, kv_tile)

    # Fold the 1/sqrt(16) = 0.25 scale into Wq (exact: power of two) and fuse K/V.
    scale = 1.0 / math.sqrt(HEAD_DIM)
    wq_scaled = (wq * scale).astype(x.dtype)
    wkv = jnp.concatenate([wk, wv], axis=1).astype(x.dtype)  # (D, 32)

    grid = (B, S // tq, S // tk)

    return pl.pallas_call(
        _attention_kernel,
        out_shape=jax.ShapeDtypeStruct((B, S, HEAD_DIM), x.dtype),
        grid_spec=pltpu.PrefetchScalarGridSpec(
            num_scalar_prefetch=0,
            grid=grid,
            in_specs=[
                # x viewed along query tiles (batch dim squeezed out of the kernel)
                pl.BlockSpec((None, tq, D), lambda b, qi, ki: (b, qi, 0)),
                # x viewed along key/value tiles
                pl.BlockSpec((None, tk, D), lambda b, qi, ki: (b, ki, 0)),
                pl.BlockSpec((D, HEAD_DIM), lambda b, qi, ki: (0, 0)),
                pl.BlockSpec((D, 2 * HEAD_DIM), lambda b, qi, ki: (0, 0)),
            ],
            out_specs=pl.BlockSpec((None, tq, HEAD_DIM),
                                   lambda b, qi, ki: (b, qi, 0)),
            scratch_shapes=[
                pltpu.VMEM((tq, HEAD_DIM), jnp.float32),  # cached q projection
                pltpu.VMEM((tq, 1), jnp.float32),          # running max
                pltpu.VMEM((tq, 1), jnp.float32),          # running denom
                pltpu.VMEM((tq, HEAD_DIM), jnp.float32),   # output accumulator
            ],
        ),
        compiler_params=pltpu.CompilerParams(
            dimension_semantics=("parallel", "parallel", "arbitrary"),
            vmem_limit_bytes=32 * 1024 * 1024,
        ),
    )(x, x, wq_scaled, wkv)


def attention_reference(x, wq, wk, wv):
    q = x @ wq
    k = x @ wk
    v = x @ wv
    att = jnp.einsum("bqd,bkd->bqk", q, k) * (1.0 / math.sqrt(HEAD_DIM))
    S = att.shape[-1]
    mask = jnp.tril(jnp.ones((S, S), dtype=bool))
    att = jnp.where(mask, att, -jnp.inf)
    att = jax.nn.softmax(att, axis=-1)
    return jnp.einsum("bqk,bkd->bqd", att, v)


if __name__ == "__main__":
    B, S, D = 2, 8, 32
    key = jax.random.PRNGKey(0)
    kx, kq, kk, kv = jax.random.split(key, 4)

    x = jax.random.normal(kx, (B, S, D), dtype=jnp.float32)
    # Deterministic init (mimics nn.Linear's uniform(-1/sqrt(D), 1/sqrt(D)))
    bound = 1.0 / math.sqrt(D)
    wq = jax.random.uniform(kq, (D, HEAD_DIM), jnp.float32, -bound, bound)
    wk = jax.random.uniform(kk, (D, HEAD_DIM), jnp.float32, -bound, bound)
    wv = jax.random.uniform(kv, (D, HEAD_DIM), jnp.float32, -bound, bound)

    # Single-tile path (whole sequence fits one block).
    out = jax.block_until_ready(attention_pallas(x, wq, wk, wv))
    ref = attention_reference(x, wq, wk, wv)
    assert out.shape == (B, S, HEAD_DIM)
    assert jnp.allclose(out, ref, atol=1e-5, rtol=1e-5)

    # Multi-tile flash path: exercises online softmax + causal tile skipping.
    S2 = 32
    x2 = jax.random.normal(jax.random.PRNGKey(1), (B, S2, D), dtype=jnp.float32)
    out2 = jax.block_until_ready(
        attention_pallas(x2, wq, wk, wv, q_tile=8, kv_tile=8))
    ref2 = attention_reference(x2, wq, wk, wv)
    assert jnp.allclose(out2, ref2, atol=1e-5, rtol=1e-5)

    print("KERNEL_OK")
</pallas_src>

<mosaic_0001>
module attributes {stable_mosaic.version = 11 : i64} {
  func.func @_attention_kernel(%arg0: i32, %arg1: i32, %arg2: i32, %arg3: memref<1x8x32xf32, #tpu.memory_space<vmem>>, %arg4: memref<1x8x32xf32, #tpu.memory_space<vmem>>, %arg5: memref<32x16xf32, #tpu.memory_space<vmem>>, %arg6: memref<32x32xf32, #tpu.memory_space<vmem>>, %arg7: memref<1x8x16xf32, #tpu.memory_space<vmem>>, %arg8: memref<8x16xf32, #tpu.memory_space<vmem>>, %arg9: memref<8x1xf32, #tpu.memory_space<vmem>>, %arg10: memref<8x1xf32, #tpu.memory_space<vmem>>, %arg11: memref<8x16xf32, #tpu.memory_space<vmem>>) attributes {dimension_semantics = [#tpu.dimension_semantics<parallel>, #tpu.dimension_semantics<parallel>, #tpu.dimension_semantics<arbitrary>], iteration_bounds = array<i64: 2, 1, 1>, scalar_prefetch = 0 : i64, scratch_operands = 4 : i64, tpu.core_type = #tpu.core_type<tc>, window_params = [{transform_indices = @transform_0, window_bounds = array<i64: 1, 8, 32>}, {transform_indices = @transform_1, window_bounds = array<i64: 1, 8, 32>}, {pipeline_mode = #tpu.pipeline_mode<synchronous>, transform_indices = @transform_2, window_bounds = array<i64: 32, 16>}, {pipeline_mode = #tpu.pipeline_mode<synchronous>, transform_indices = @transform_3, window_bounds = array<i64: 32, 32>}, {transform_indices = @transform_4, window_bounds = array<i64: 1, 8, 16>}]} {
    %c8_i32 = arith.constant 8 : i32
    %0 = arith.muli %arg1, %c8_i32 : i32
    %c7_i32 = arith.constant 7 : i32
    %1 = arith.addi %0, %c7_i32 : i32
    %c8_i32_0 = arith.constant 8 : i32
    %2 = arith.muli %arg2, %c8_i32_0 : i32
    %c7_i32_1 = arith.constant 7 : i32
    %3 = arith.addi %2, %c7_i32_1 : i32
    %c0_i32 = arith.constant 0 : i32
    %4 = arith.cmpi eq, %arg2, %c0_i32 : i32
    %5 = arith.extui %4 : i1 to i32
    %c0_i32_2 = arith.constant 0 : i32
    %6 = arith.cmpi ne, %5, %c0_i32_2 : i32
    scf.if %6 {
      %c0 = arith.constant 0 : index
      %c0_7 = arith.constant 0 : index
      %c0_8 = arith.constant 0 : index
      %19 = vector.load %arg3[%c0, %c0_7, %c0_8] : memref<1x8x32xf32, #tpu.memory_space<vmem>>, vector<1x8x32xf32>
      %20 = vector.shape_cast %19 : vector<1x8x32xf32> to vector<8x32xf32>
      %c0_9 = arith.constant 0 : index
      %c0_10 = arith.constant 0 : index
      %21 = vector.load %arg5[%c0_9, %c0_10] : memref<32x16xf32, #tpu.memory_space<vmem>>, vector<32x16xf32>
      %cst = arith.constant dense<0.000000e+00> : vector<8x16xf32>
      %22 = tpu.matmul %20, %21, %cst {dimension_numbers = #tpu.dot_dimension_numbers<[1], [0], [0], [1], [0, 0, 1, 1], [], []>} : vector<8x32xf32>, vector<32x16xf32>, vector<8x16xf32> -> vector<8x16xf32>
      %c0_11 = arith.constant 0 : index
      %c0_12 = arith.constant 0 : index
      %23 = vector.load %arg8[%c0_11, %c0_12] : memref<8x16xf32, #tpu.memory_space<vmem>>, vector<8x16xf32>
      tpu.vector_store %arg8[%c0_11, %c0_12], %22 {strides = array<i32>} : memref<8x16xf32, #tpu.memory_space<vmem>>, vector<8x16xf32>,
      %cst_13 = arith.constant 0xFF800000 : f32
      %24 = vector.broadcast %cst_13 : f32 to vector<8x1xf32>
      %c0_14 = arith.constant 0 : index
      %c0_15 = arith.constant 0 : index
      %25 = vector.load %arg9[%c0_14, %c0_15] : memref<8x1xf32, #tpu.memory_space<vmem>>, vector<8x1xf32>
      tpu.vector_store %arg9[%c0_14, %c0_15], %24 {strides = array<i32>} : memref<8x1xf32, #tpu.memory_space<vmem>>, vector<8x1xf32>,
      %cst_16 = arith.constant 0.000000e+00 : f32
      %26 = vector.broadcast %cst_16 : f32 to vector<8x1xf32>
      %c0_17 = arith.constant 0 : index
      %c0_18 = arith.constant 0 : index
      %27 = vector.load %arg10[%c0_17, %c0_18] : memref<8x1xf32, #tpu.memory_space<vmem>>, vector<8x1xf32>
      tpu.vector_store %arg10[%c0_17, %c0_18], %26 {strides = array<i32>} : memref<8x1xf32, #tpu.memory_space<vmem>>, vector<8x1xf32>,
      %cst_19 = arith.constant 0.000000e+00 : f32
      %28 = vector.broadcast %cst_19 : f32 to vector<8x16xf32>
      %c0_20 = arith.constant 0 : index
      %c0_21 = arith.constant 0 : index
      %29 = vector.load %arg11[%c0_20, %c0_21] : memref<8x16xf32, #tpu.memory_space<vmem>>, vector<8x16xf32>
      tpu.vector_store %arg11[%c0_20, %c0_21], %28 {strides = array<i32>} : memref<8x16xf32, #tpu.memory_space<vmem>>, vector<8x16xf32>,
    } else {
    }
    %7 = arith.cmpi sle, %2, %1 : i32
    %8 = arith.cmpi sgt, %3, %0 : i32
    %9 = arith.andi %7, %8 : i1
    %10 = arith.extui %9 : i1 to i32
    %c0_i32_3 = arith.constant 0 : i32
    %11 = arith.cmpi ne, %10, %c0_i32_3 : i32
    scf.if %11 {
      %c0 = arith.constant 0 : index
      %c0_7 = arith.constant 0 : index
      %c0_8 = arith.constant 0 : index
      %19 = vector.load %arg4[%c0, %c0_7, %c0_8] : memref<1x8x32xf32, #tpu.memory_space<vmem>>, vector<1x8x32xf32>
      %20 = vector.shape_cast %19 : vector<1x8x32xf32> to vector<8x32xf32>
      %c0_9 = arith.constant 0 : index
      %c0_10 = arith.constant 0 : index
      %21 = vector.load %arg6[%c0_9, %c0_10] : memref<32x32xf32, #tpu.memory_space<vmem>>, vector<32x32xf32>
      %cst = arith.constant dense<0.000000e+00> : vector<8x32xf32>
      %22 = tpu.matmul %20, %21, %cst {dimension_numbers = #tpu.dot_dimension_numbers<[1], [0], [0], [1], [0, 0, 1, 1], [], []>} : vector<8x32xf32>, vector<32x32xf32>, vector<8x32xf32> -> vector<8x32xf32>
      %23 = vector.extract_strided_slice %22 {offsets = [0, 0], sizes = [8, 16], strides = [1, 1]} : vector<8x32xf32> to vector<8x16xf32>
      %24 = vector.extract_strided_slice %22 {offsets = [0, 16], sizes = [8, 16], strides = [1, 1]} : vector<8x32xf32> to vector<8x16xf32>
      %c0_11 = arith.constant 0 : index
      %c0_12 = arith.constant 0 : index
      %25 = vector.load %arg8[%c0_11, %c0_12] : memref<8x16xf32, #tpu.memory_space<vmem>>, vector<8x16xf32>
      %cst_13 = arith.constant dense<0.000000e+00> : vector<8x8xf32>
      %26 = tpu.matmul %25, %23, %cst_13 {dimension_numbers = #tpu.dot_dimension_numbers<[1], [1], [0], [0], [0, 0, 1, 0], [], []>} : vector<8x16xf32>, vector<8x16xf32>, vector<8x8xf32> -> vector<8x8xf32>
      %27 = tpu.iota {dimensions = array<i32: 0>} : vector<8x8xi32>
      %28 = vector.broadcast %0 : i32 to vector<8x8xi32>
      %29 = arith.addi %28, %27 : vector<8x8xi32>
      %30 = tpu.iota {dimensions = array<i32: 1>} : vector<8x8xi32>
      %31 = vector.broadcast %2 : i32 to vector<8x8xi32>
      %32 = arith.addi %31, %30 : vector<8x8xi32>
      %33 = arith.cmpi sle, %32, %29 : vector<8x8xi32>
      %cst_14 = arith.constant -1.000000e+30 : f32
      %34 = vector.broadcast %cst_14 : f32 to vector<8x8xf32>
      %35 = arith.select %33, %26, %34 : vector<8x8xi1>, vector<8x8xf32>
      %c0_15 = arith.constant 0 : index
      %c0_16 = arith.constant 0 : index
      %36 = vector.load %arg9[%c0_15, %c0_16] : memref<8x1xf32, #tpu.memory_space<vmem>>, vector<8x1xf32>
      %cst_17 = arith.constant dense<0xFF800000> : vector<8xf32>
      %37 = vector.multi_reduction <maximumf>, %35, %cst_17 [1] : vector<8x8xf32> to vector<8xf32>
      %38 = vector.shape_cast %37 : vector<8xf32> to vector<8x1xf32>
      %39 = arith.maximumf %36, %38 : vector<8x1xf32>
      %40 = arith.subf %36, %39 : vector<8x1xf32>
      %41 = math.exp %40 : vector<8x1xf32>
      %42 = vector.broadcast %39 : vector<8x1xf32> to vector<8x8xf32>
      %43 = arith.subf %35, %42 : vector<8x8xf32>
      %44 = math.exp %43 : vector<8x8xf32>
      %c0_18 = arith.constant 0 : index
      %c0_19 = arith.constant 0 : index
      %45 = vector.load %arg10[%c0_18, %c0_19] : memref<8x1xf32, #tpu.memory_space<vmem>>, vector<8x1xf32>
      %46 = arith.mulf %41, %45 : vector<8x1xf32>
      %cst_20 = arith.constant dense<0.000000e+00> : vector<8xf32>
      %47 = vector.multi_reduction <add>, %44, %cst_20 [1] : vector<8x8xf32> to vector<8xf32>
      %48 = vector.shape_cast %47 : vector<8xf32> to vector<8x1xf32>
      %49 = arith.addf %46, %48 : vector<8x1xf32>
      %c0_21 = arith.constant 0 : index
      %c0_22 = arith.constant 0 : index
      %50 = vector.load %arg10[%c0_21, %c0_22] : memref<8x1xf32, #tpu.memory_space<vmem>>, vector<8x1xf32>
      tpu.vector_store %arg10[%c0_21, %c0_22], %49 {strides = array<i32>} : memref<8x1xf32, #tpu.memory_space<vmem>>, vector<8x1xf32>,
      %c0_23 = arith.constant 0 : index
      %c0_24 = arith.constant 0 : index
      %51 = vector.load %arg11[%c0_23, %c0_24] : memref<8x16xf32, #tpu.memory_space<vmem>>, vector<8x16xf32>
      %52 = vector.broadcast %41 : vector<8x1xf32> to vector<8x16xf32>
      %53 = arith.mulf %52, %51 : vector<8x16xf32>
      %cst_25 = arith.constant dense<0.000000e+00> : vector<8x16xf32>
      %54 = tpu.matmul %44, %24, %cst_25 {dimension_numbers = #tpu.dot_dimension_numbers<[1], [0], [0], [1], [0, 0, 1, 1], [], []>} : vector<8x8xf32>, vector<8x16xf32>, vector<8x16xf32> -> vector<8x16xf32>
      %55 = arith.addf %53, %54 : vector<8x16xf32>
      %c0_26 = arith.constant 0 : index
      %c0_27 = arith.constant 0 : index
      %56 = vector.load %arg11[%c0_26, %c0_27] : memref<8x16xf32, #tpu.memory_space<vmem>>, vector<8x16xf32>
      tpu.vector_store %arg11[%c0_26, %c0_27], %55 {strides = array<i32>} : memref<8x16xf32, #tpu.memory_space<vmem>>, vector<8x16xf32>,
      %c0_28 = arith.constant 0 : index
      %c0_29 = arith.constant 0 : index
      %57 = vector.load %arg9[%c0_28, %c0_29] : memref<8x1xf32, #tpu.memory_space<vmem>>, vector<8x1xf32>
      tpu.vector_store %arg9[%c0_28, %c0_29], %39 {strides = array<i32>} : memref<8x1xf32, #tpu.memory_space<vmem>>, vector<8x1xf32>,
    } else {
    }
    %true = arith.constant true
    %12 = arith.xori %8, %true : i1
    %13 = arith.andi %7, %12 : i1
    %14 = arith.extui %13 : i1 to i32
    %c0_i32_4 = arith.constant 0 : i32
    %15 = arith.cmpi ne, %14, %c0_i32_4 : i32
    scf.if %15 {
      %c0 = arith.constant 0 : index
      %c0_7 = arith.constant 0 : index
      %c0_8 = arith.constant 0 : index
      %19 = vector.load %arg4[%c0, %c0_7, %c0_8] : memref<1x8x32xf32, #tpu.memory_space<vmem>>, vector<1x8x32xf32>
      %20 = vector.shape_cast %19 : vector<1x8x32xf32> to vector<8x32xf32>
      %c0_9 = arith.constant 0 : index
      %c0_10 = arith.constant 0 : index
      %21 = vector.load %arg6[%c0_9, %c0_10] : memref<32x32xf32, #tpu.memory_space<vmem>>, vector<32x32xf32>
      %cst = arith.constant dense<0.000000e+00> : vector<8x32xf32>
      %22 = tpu.matmul %20, %21, %cst {dimension_numbers = #tpu.dot_dimension_numbers<[1], [0], [0], [1], [0, 0, 1, 1], [], []>} : vector<8x32xf32>, vector<32x32xf32>, vector<8x32xf32> -> vector<8x32xf32>
      %23 = vector.extract_strided_slice %22 {offsets = [0, 0], sizes = [8, 16], strides = [1, 1]} : vector<8x32xf32> to vector<8x16xf32>
      %24 = vector.extract_strided_slice %22 {offsets = [0, 16], sizes = [8, 16], strides = [1, 1]} : vector<8x32xf32> to vector<8x16xf32>
      %c0_11 = arith.constant 0 : index
      %c0_12 = arith.constant 0 : index
      %25 = vector.load %arg8[%c0_11, %c0_12] : memref<8x16xf32, #tpu.memory_space<vmem>>, vector<8x16xf32>
      %cst_13 = arith.constant dense<0.000000e+00> : vector<8x8xf32>
      %26 = tpu.matmul %25, %23, %cst_13 {dimension_numbers = #tpu.dot_dimension_numbers<[1], [1], [0], [0], [0, 0, 1, 0], [], []>} : vector<8x16xf32>, vector<8x16xf32>, vector<8x8xf32> -> vector<8x8xf32>
      %c0_14 = arith.constant 0 : index
      %c0_15 = arith.constant 0 : index
      %27 = vector.load %arg9[%c0_14, %c0_15] : memref<8x1xf32, #tpu.memory_space<vmem>>, vector<8x1xf32>
      %cst_16 = arith.constant dense<0xFF800000> : vector<8xf32>
      %28 = vector.multi_reduction <maximumf>, %26, %cst_16 [1] : vector<8x8xf32> to vector<8xf32>
      %29 = vector.shape_cast %28 : vector<8xf32> to vector<8x1xf32>
      %30 = arith.maximumf %27, %29 : vector<8x1xf32>
      %31 = arith.subf %27, %30 : vector<8x1xf32>
      %32 = math.exp %31 : vector<8x1xf32>
      %33 = vector.broadcast %30 : vector<8x1xf32> to vector<8x8xf32>
      %34 = arith.subf %26, %33 : vector<8x8xf32>
      %35 = math.exp %34 : vector<8x8xf32>
      %c0_17 = arith.constant 0 : index
      %c0_18 = arith.constant 0 : index
      %36 = vector.load %arg10[%c0_17, %c0_18] : memref<8x1xf32, #tpu.memory_space<vmem>>, vector<8x1xf32>
      %37 = arith.mulf %32, %36 : vector<8x1xf32>
      %cst_19 = arith.constant dense<0.000000e+00> : vector<8xf32>
      %38 = vector.multi_reduction <add>, %35, %cst_19 [1] : vector<8x8xf32> to vector<8xf32>
      %39 = vector.shape_cast %38 : vector<8xf32> to vector<8x1xf32>
      %40 = arith.addf %37, %39 : vector<8x1xf32>
      %c0_20 = arith.constant 0 : index
      %c0_21 = arith.constant 0 : index
      %41 = vector.load %arg10[%c0_20, %c0_21] : memref<8x1xf32, #tpu.memory_space<vmem>>, vector<8x1xf32>
      tpu.vector_store %arg10[%c0_20, %c0_21], %40 {strides = array<i32>} : memref<8x1xf32, #tpu.memory_space<vmem>>, vector<8x1xf32>,
      %c0_22 = arith.constant 0 : index
      %c0_23 = arith.constant 0 : index
      %42 = vector.load %arg11[%c0_22, %c0_23] : memref<8x16xf32, #tpu.memory_space<vmem>>, vector<8x16xf32>
      %43 = vector.broadcast %32 : vector<8x1xf32> to vector<8x16xf32>
      %44 = arith.mulf %43, %42 : vector<8x16xf32>
      %cst_24 = arith.constant dense<0.000000e+00> : vector<8x16xf32>
      %45 = tpu.matmul %35, %24, %cst_24 {dimension_numbers = #tpu.dot_dimension_numbers<[1], [0], [0], [1], [0, 0, 1, 1], [], []>} : vector<8x8xf32>, vector<8x16xf32>, vector<8x16xf32> -> vector<8x16xf32>
      %46 = arith.addf %44, %45 : vector<8x16xf32>
      %c0_25 = arith.constant 0 : index
      %c0_26 = arith.constant 0 : index
      %47 = vector.load %arg11[%c0_25, %c0_26] : memref<8x16xf32, #tpu.memory_space<vmem>>, vector<8x16xf32>
      tpu.vector_store %arg11[%c0_25, %c0_26], %46 {strides = array<i32>} : memref<8x16xf32, #tpu.memory_space<vmem>>, vector<8x16xf32>,
      %c0_27 = arith.constant 0 : index
      %c0_28 = arith.constant 0 : index
      %48 = vector.load %arg9[%c0_27, %c0_28] : memref<8x1xf32, #tpu.memory_space<vmem>>, vector<8x1xf32>
      tpu.vector_store %arg9[%c0_27, %c0_28], %30 {strides = array<i32>} : memref<8x1xf32, #tpu.memory_space<vmem>>, vector<8x1xf32>,
    } else {
    }
    %c0_i32_5 = arith.constant 0 : i32
    %16 = arith.cmpi eq, %arg2, %c0_i32_5 : i32
    %17 = arith.extui %16 : i1 to i32
    %c0_i32_6 = arith.constant 0 : i32
    %18 = arith.cmpi ne, %17, %c0_i32_6 : i32
    scf.if %18 {
      %c0 = arith.constant 0 : index
      %c0_7 = arith.constant 0 : index
      %19 = vector.load %arg11[%c0, %c0_7] : memref<8x16xf32, #tpu.memory_space<vmem>>, vector<8x16xf32>
      %c0_8 = arith.constant 0 : index
      %c0_9 = arith.constant 0 : index
      %20 = vector.load %arg10[%c0_8, %c0_9] : memref<8x1xf32, #tpu.memory_space<vmem>>, vector<8x1xf32>
      %21 = tpu.reciprocal %20 : vector<8x1xf32> -> vector<8x1xf32>
      %22 = vector.broadcast %21 : vector<8x1xf32> to vector<8x16xf32>
      %23 = arith.mulf %19, %22 : vector<8x16xf32>
      %c0_10 = arith.constant 0 : index
      %c0_11 = arith.constant 0 : index
      %c0_12 = arith.constant 0 : index
      %24 = vector.load %arg7[%c0_10, %c0_11, %c0_12] : memref<1x8x16xf32, #tpu.memory_space<vmem>>, vector<1x8x16xf32>
      %25 = vector.shape_cast %24 : vector<1x8x16xf32> to vector<8x16xf32>
      %26 = vector.shape_cast %23 : vector<8x16xf32> to vector<1x8x16xf32>
      tpu.vector_store %arg7[%c0_10, %c0_11, %c0_12], %26 {strides = array<i32>} : memref<1x8x16xf32, #tpu.memory_space<vmem>>, vector<1x8x16xf32>,
    } else {
    }
    return
  }
  func.func @transform_0(%arg0: i32, %arg1: i32, %arg2: i32) -> (i32, i32, i32) {
    %c0_i32 = arith.constant 0 : i32
    %c0_i32_0 = arith.constant 0 : i32
    return %arg0, %arg1, %c0_i32 : i32, i32, i32
  }
  func.func @transform_1(%arg0: i32, %arg1: i32, %arg2: i32) -> (i32, i32, i32) {
    %c0_i32 = arith.constant 0 : i32
    %c0_i32_0 = arith.constant 0 : i32
    return %arg0, %arg2, %c0_i32 : i32, i32, i32
  }
  func.func @transform_2(%arg0: i32, %arg1: i32, %arg2: i32) -> (i32, i32) {
    %c0_i32 = arith.constant 0 : i32
    %c0_i32_0 = arith.constant 0 : i32
    %c0_i32_1 = arith.constant 0 : i32
    return %c0_i32, %c0_i32_0 : i32, i32
  }
  func.func @transform_3(%arg0: i32, %arg1: i32, %arg2: i32) -> (i32, i32) {
    %c0_i32 = arith.constant 0 : i32
    %c0_i32_0 = arith.constant 0 : i32
    %c0_i32_1 = arith.constant 0 : i32
    return %c0_i32, %c0_i32_0 : i32, i32
  }
  func.func @transform_4(%arg0: i32, %arg1: i32, %arg2: i32) -> (i32, i32, i32) {
    %c0_i32 = arith.constant 0 : i32
    %c0_i32_0 = arith.constant 0 : i32
    return %arg0, %arg1, %c0_i32 : i32, i32, i32
  }
}

</mosaic_0001>

<bundles_post_ra>
// kernel: tpu_custom_call.1
= control target key start
LH: loop header
LB: loop body
LE: loop exit
PB: predicated region body
PF: predicated region fallthrough
CT: control target
= control target key end

     0   :  { %9 = vsyncpa [#allocation7], 0  ;;  %s1515_s0 = inlined_call_operand.vmem [shape: f32[2,8,32], index: 0, kind: input, shape index: {}]   ;;  %s1516_s1 = inlined_call_operand.hbm [shape: f32[2,8,32], index: 1, kind: input, shape index: {}]   ;;  %s1517_s2 = inlined_call_operand.vmem [shape: f32[32,16], index: 2, kind: input, shape index: {}]   ;;  %s1518_s3 = inlined_call_operand.vmem [shape: f32[32,32], index: 3, kind: input, shape index: {}]   ;;  %s1519_s4 = inlined_call_operand.hbm [shape: f32[2,8,16], index: 4, kind: output, shape index: {}]  }
   0x1   :  { %11 = vsyncpa [#allocation7 + $0x1], 0 }
   0x2   :  { %12 = vsyncpa [#allocation8], 0 }
   0x3   :  { %14 = vsyncpa [#allocation8 + $0x1], 0  ;;  %s1328_s15 = smov 0   ;;  %s1330_s16 = smov 0  }
   0x4   :  { %s1332_s17 = smov 0   ;;  %s1334_s18 = smov 0  }
   0x5   :  { %s1336_s19 = smov 0   ;;  %s1338_s20 = smov 0  }
   0x6 LB: > { %s1042_s21 = sadd.s32 4294967295, %s1294_s20   ;;  %s1043_s22 = sadd.s32 4294967294, %s1294_s20   ;;  %s1294_s20 = sphi %s1338_s20, %s20_s20   ;;  %s1290_s19 = sphi %s1336_s19, %s1531_s19   ;;  %s1286_s18 = sphi %s1334_s18, %s1530_s18   ;;  %s1282_s17 = sphi %s1332_s17, %s1529_s17   ;;  %s1278_s16 = sphi %s1330_s16, %s1528_s16   ;;  %s1274_s15 = sphi %s1328_s15, %s1527_s15  }
   0x7   : > { %s39_s23 = sadd.s32 1, %s1290_s19  ;;  %s76_s24 = sadd.s32 1, %s1282_s17 }
   0x8   : > { %p41_p0 = scmp.ge.s32.totalorder %s39_s23, 2  ;;  %p83_p1 = scmp.ne.s32.totalorder %s1282_s17, %s1278_s16 }
   0x9   : > { %p84_p2 = scmp.eq.s32.totalorder %s1294_s20, 0  ;;  %p89_p3 = scmp.ne.s32.totalorder %s1278_s16, %s1274_s15 }
   0xa   : > { %s1533_s23 = smov (%p41_p0, %s39_s23), 0  ;;  %p90_p5 = scmp.eq.s32.totalorder %s1042_s21, 0 }
   0xb   : > { %p1369_p4 = por %p84_p2, %p83_p1  ;;  %s71_s26 = ssub.s32 %s1290_s19, %s1533_s23 }
   0xc   : > { %p157_p6 = scmp.eq.s32.totalorder %s1042_s21, 1  ;;  %p74_p7 = scmp.eq.s32.totalorder %s71_s26, 0 }
   0xd   : > { %p1375_p8 = por %p90_p5, %p89_p3  ;;  %p163_p10 = scmp.eq.s32.totalorder %s1043_s22, 1 }
   0xe   : > { %p1379_p9 = por %p157_p6, %p83_p1  ;;  %p1123_p13 = scmp.lt.s32.totalorder %s1294_s20, 2 }
   0xf   : > { %s1384_s29 = scalar_select %p74_p7, %s1282_s17, %s76_s24  }
  0x10   : > { %p1386_p11 = por %p163_p10, %p89_p3  ;;  %s199_s5 = sand.u32 1, %s1282_s17  }
  0x11   : > { %s1046_s6 = sshll.u32 %s199_s5, 3  ;;  %s1047_s7 = sshll.u32 %s1290_s19, 7 }
  0x12   : > { %s1523_s30 = scalar_select %p1386_p11, 1, 0 }
  0x13   : > { %s209_s10 = scalar_lea.hbm %s1516_s1, %s1047_s7  ;;  %s203_s11 = scalar_lea.vmem [#allocation6], %s1046_s6 }
  0x14   : > { %s211_s12 = sshll.u32 %s203_s11, 4  ;;  %p1399_p0 = pnand %p1123_p13, %p1369_p4  ;;  %s212_s12 = int_to_ptr.vmem [resolvable:$true] %s211_s12 }
  0x15   : > { %p1048_p1 = scmp.ge.s32.totalorder %s1294_s20, 1  ;;  %p216_p2 = scmp.lt.s32.totalorder %s1294_s20, 3 }
  0x16   : > { %s200_s14 = scalar_lea.sflag [#allocation7], %s199_s5  ;;  %p1188_p3 = pneg %p1399_p0 }
  0x17   : > { %s1199_s21 = scalar_lea.vmem %s212_s12, 128  ;;  %s1296_s22 = smov [#allocation6]  }
  0x18   : > { %p1200_p5 = scmp.ne.s32.totalorder %s212_s12, %s1199_s21  ;;  %s1204_s24 = sshll.u32 %s1296_s22, 4  ;;  %s1205_s24 = int_to_ptr.vmem [resolvable:$false] %s1204_s24 }
  0x19   : > { %s1206_s26 = scalar_lea.vmem %s1205_s24, 256  ;;  %p1207_p10 = scmp.lt.s32.totalorder %s212_s12, %s1205_s24 }
  0x1a   : > { %p1202_p6 = pnand %p1200_p5, %p1188_p3  ;;  %p1208_p12 = scmp.lt.s32.totalorder %s1206_s26, %s1199_s21 }
  0x1c   : > { %p1203_p7 = pneg %p1202_p6  ;;  %p1209_p4 = por %p1208_p12, %p1207_p10 }
  0x1e   : > { %p1210_p13 = pnand %p1209_p4, %p1203_p7 }
  0x20   : > { %1213 = shalt.err (!%p1210_p13)
}
  0x21   : > { %1118 = dma.hbm_to_vmem [thread:$0]  (!%p1399_p0), %s209_s10, 128, %s212_s12, %s200_s14  }
  0x22   : > { %p217_p11 = pnand %p1048_p1, %p216_p2 }
  0x23   : > { %s1414_s25 = sand.u32 (!%p217_p11), 1, %s1278_s16  }
  0x24   : > { %220 = sbr.rel (%p217_p11) target bundleno = 1032 (0x408), region = 36  ;;  %s1049_s5 = sshll.u32 (!%p217_p11), %s1414_s25, 3 }
  0x25   : > { %s223_s6 = scalar_lea.sflag (!%p217_p11), [#allocation7], %s1414_s25  ;;  %s1420_s7 = scalar_lea.vmem (!%p217_p11), [#allocation6], %s1049_s5 }
  0x29   : > { %1265 = dma.done.wait (%p1375_p8), %s223_s6, 128  }
  0x2a   : > { %1267 = vsyncadd (%p1375_p8), %s223_s6, 4294967168  ;;  %p258_p11 = scmp.lt.s32.totalorder %s1286_s18, 1  ;;  %v1297_v0 = vmov 0.0   ;;  %vm1298_vm0 = vmmov 0   ;;  %v277_v1 = vld [vmem:[%s1517_s2 + $0x18] sm:$0xff]  ;;  %v276_v2 = vld [vmem:[%s1517_s2 + $0x10] sm:$0xff]  ;;  %v521_v18 = vlaneseq }
  0x2b   : > { %1079 = vmatprep.subr.mxu0 %v1297_v0  ;;  %1090 = vmatprep.subr.mxu1 %v1297_v0  ;;  %v368_v3 = vld [vmem:[%s1518_s3 + $0x18] sm:$0xff]  ;;  %v367_v4 = vld [vmem:[%s1518_s3 + $0x10] sm:$0xff]  ;;  %v275_v5 = vld [vmem:[%s1517_s2 + $0x8] sm:$0xff]  ;;  %vm278_vm1 = vcmask 261120   ;;  %vm352_vm2 = vcmask 130048   ;;  %vm354_vm3 = vcmask 7168  }
  0x2c   : > { %1087 = vmatprep.mubr.msk.f32.mxu0 %vm1298_vm0, %v1297_v0  ;;  %s259_s8 = scalar_select %p258_p11, %s1286_s18, 1  ;;  %1098 = vmatprep.mubr.msk.f32.mxu1 %vm1298_vm0, %v1297_v0  ;;  %v366_v6 = vld [vmem:[%s1518_s3 + $0x8] sm:$0xff]  ;;  %v274_v7 = vld [vmem:[%s1517_s2] sm:$0xff]  ;;  %357 = vst.msk [vmem:[#allocation5] sm:$0xff] %vm352_vm2, %v1297_v0  ;;  %v1300_v16 = vmov -inf   ;;  %v522_v19 = vshrl.u32 %v521_v18, 7 }
  0x2d   : > { %1080 = vmatpush3.msra.mxu0 %v277_v1  ;;  %1091 = vmatpush3.msra.mxu1 %v368_v3  ;;  %v365_v8 = vld [vmem:[%s1518_s3] sm:$0xff]  ;;  %355 = vst.msk [vmem:[#allocation3] sm:$0xff] %vm354_vm3, %v1300_v16  ;;  %356 = vst.msk [vmem:[#allocation4] sm:$0xff] %vm354_vm3, %v1297_v0  ;;  %v526_v20 = vand.u32 127, %v521_v18  ;;  %vm532_vm5 = vcmask 64512   ;;  %v1301_v25 = vmov 0  }
  0x2e   : > { %s1051_s9 = sshll.u32 %s259_s8, 3  ;;  %1081 = vmatprep.subr.mxu0 %v1297_v0  ;;  %1092 = vmatprep.subr.mxu1 %v1297_v0  ;;  %v364_v10 = vld [vmem:[%s1420_s7] sm:$0xff]  ;;  %s1299_s7 = smov 112  }
  0x2f   : > { %s264_s12 = scalar_lea.vmem %s1515_s0, %s1051_s9  ;;  %1082 = vmatpush3.msra.mxu0 %v276_v2  ;;  %1093 = vmatpush3.msra.mxu1 %v367_v4  ;;  %vm529_vm4 = vcmp.le.s32.totalorder %v526_v20, %v522_v19  ;;  %s1062_s9 = sshll.u32 %s1286_s18, 7 }
  0x30   : > { %1083 = vmatprep.subr.mxu0 %v1297_v0  ;;  %1094 = vmatprep.subr.mxu1 %v1297_v0  ;;  %v273_v9 = vld [vmem:[%s264_s12] sm:$0xff]  ;;  %s257_s22 = scalar_lea.vmem [#allocation9], %s1049_s5  ;;  %s942_s8 = scalar_lea.hbm %s1519_s4, %s1062_s9 }
  0x31   : > { %1084 = vmatpush3.msra.mxu0 %v275_v5  ;;  %1095 = vmatpush3.msra.mxu1 %v366_v6  ;;  %s944_s24 = sshll.u32 %s257_s22, 4  ;;  %s930_s10 = scalar_lea.sflag [#allocation8], %s1414_s25  ;;  %s945_s24 = int_to_ptr.vmem [resolvable:$true] %s944_s24 }
  0x32   : > { %1085 = vmatprep.subr.mxu0 %v1297_v0  ;;  %1096 = vmatprep.subr.mxu1 %v1297_v0  ;;  %s1214_s11 = scalar_lea.vmem %s945_s24, 128  ;;  %s1302_s18 = smov [#allocation9]  }
  0x33   : > { %1086 = vmatpush3.msra.mxu0 %v274_v7  ;;  %1097 = vmatpush3.msra.mxu1 %v365_v8  ;;  %v556_v43 = vld [vmem:[#allocation5] sm:$0xff]  ;;  %p1215_p8 = scmp.ne.s32.totalorder %s945_s24, %s1214_s11  ;;  %s1218_s12 = sshll.u32 %s1302_s18, 4  ;;  %s1219_s12 = int_to_ptr.vmem [resolvable:$false] %s1218_s12 }
  0x34   : > { %1088 = vmatmul.mubr.msk.f32.vlgmr.msra.gmra.mxu0 %vm278_vm1, %v273_v9  ;;  %1099 = vmatmul.mubr.msk.f32.vlgmr.msra.gmra.mxu1 %vm278_vm1, %v364_v10  ;;  %v531_v26 = vld [vmem:[#allocation3] sm:$0xff]  ;;  %v548_v37 = vld [vmem:[#allocation4] sm:$0xff]  ;;  %s1220_s5 = scalar_lea.vmem %s1219_s12, 256  ;;  %p1221_p1 = scmp.lt.s32.totalorder %s945_s24, %s1219_s12 }
  0x35   : > { %1101 = vmatprep.subr.mxu0 %v1297_v0  ;;  %1103 = vmatprep.mubr.msk.f32.mxu0 %vm1298_vm0, %v1297_v0  ;;  %p1216_p12 = pnand %p1215_p8, %p1379_p9  ;;  %p1222_p2 = scmp.lt.s32.totalorder %s1220_s5, %s1214_s11 }
  0x36   : > { %1106 = vmatprep.subr.mxu1 %v1297_v0  ;;  %1108 = vmatprep.mubr.msk.f32.mxu1 %vm1298_vm0, %v1297_v0 }
  0x37   : > { %1178 = vset.pattern.permute.xlu0 %v1301_v25  ;;  %1179 = vset.pattern.permute.xlu1 %v1301_v25  ;;  %p1217_p0 = pneg %p1216_p12  ;;  %p1223_p3 = por %p1222_p2, %p1221_p1 }
  0x39   : > { %p1224_p5 = pnand %p1223_p3, %p1217_p0 }
  0xf4   : > { %v348_v11 = vpop.f32.mrf.mxu0  ;;  %v439_v12 = vpop.f32.mrf.mxu1 }
  0xf5   : > { %353 = vst.msk [vmem:[#allocation2] sm:$0xff] %vm352_vm2, %v348_v11  ;;  %563 = vrot.lane.b32.xlu1 %v439_v12, %s1299_s7  ;;  %1102 = vmatpush3.xpose.msk.msra.mxu0 %vm352_vm2, %v439_v12 }
  0xf6   : > { %v1089_v13 = vpop.f32.mrf.mxu0  ;;  %v1100_v14 = vpop.f32.mrf.mxu1 }
  0xfc   : > { %v443_v15 = vld [vmem:[#allocation2] sm:$0xff] }
  0xfd   : > { %1104 = vmatmul.mubr.msk.f32.vlgmr.msra.gmra.mxu0 %vm352_vm2, %v443_v15 }
 0x167   : > { %v564_v17 = vpop.permute.xlu1 %563 }
 0x168   : > { %1107 = vmatpush3.msra.mxu1 %v564_v17 }
 0x1bd   : > { %v517_v21 = vpop.f32.mrf.mxu0 }
 0x1be   : > { %v530_v22 = vsel %vm529_vm4, %v517_v21, -1e+30 }
 0x1bf   : > { %v1105_v23 = vpop.f32.mrf.mxu0  ;;  %v533_v24 = vsel %vm532_vm5, %v530_v22, -inf }
 0x1c0   : > { %534 = vmax.xlane.f32.xlu0 %v533_v24 }
 0x249   : > { %v535_v27 = vpop.xlane.xlu0 %534 }
 0x24a   : > { %v536_v28 = vmax.f32 %v531_v26, %v535_v27 }
 0x24c   : > { %v537_v29 = vsub.f32 %v531_v26, %v536_v28  ;;  %641 = vst.msk [vmem:[#allocation3] sm:$0xff] %vm354_vm3, %v536_v28  ;;  %542 = vperm.xlu0 %1178, %v536_v28  }
 0x24e   : > { %v538_v34 = vmul.f32 1.442695, %v537_v29 }
 0x2c7   : > { %v543_v30 = vpop.permute.xlu0 %542 }
 0x2c8   : > { %v545_v31 = vsub.f32 %v530_v22, %v543_v30 }
 0x2ca   : > { %v546_v32 = vmul.f32 1.442695, %v545_v31 }
 0x2cc   : > { %1180 = vpow2.f32 %v546_v32 }
 0x2cd   : > { %1182 = vpow2.f32 %v538_v34 }
 0x2d9   : > { %v1181_v33 = vpop.eup %1180 }
 0x2da   : > { %1109 = vmatmul.mubr.msk.f32.vlgmr.msra.gmra.mxu1 %vm532_vm5, %v1181_v33  ;;  %v550_v35 = vsel %vm532_vm5, %v1181_v33, 0.0  ;;  %v1183_v36 = vpop.eup %1182 }
 0x2db   : > { %551 = vadd.xlane.f32.xlu1 %v550_v35  ;;  %v549_v38 = vmul.f32 %v1183_v36, %v548_v37 }
 0x2ec   : > { %559 = vperm.xlu1 %1179, %v1183_v36  }
 0x364   : > { %v552_v39 = vpop.xlane.xlu1 %551 }
 0x365   : > { %v553_v40 = vadd.f32 %v552_v39, %v549_v38 }
 0x367   : > { %555 = vst.msk [vmem:[#allocation4] sm:$0xff] %vm354_vm3, %v553_v40 }
 0x368   : > { %v560_v44 = vpop.permute.xlu1 %559 }
 0x369   : > { %v562_v45 = vmul.f32 %v560_v44, %v556_v43 }
 0x36e   : > { %v919_v41 = vld [vmem:[#allocation4] sm:$0xff] }
 0x36f   : > { %1184 = vrcp.f32 %v919_v41 }
 0x37c   : > { %v1185_v42 = vpop.eup %1184 }
 0x37d   : > { %923 = vperm.xlu0 %1178, %v1185_v42  }
 0x39a   : > { %v635_v46 = vpop.f32.mrf.mxu1 }
 0x39b   : > { %v639_v47 = vadd.f32 %v635_v46, %v562_v45 }
 0x39c   : > { %v1110_v48 = vpop.f32.mrf.mxu1 }
 0x39d   : > { %640 = vst.msk [vmem:[#allocation5] sm:$0xff] %vm352_vm2, %v639_v47 }
 0x3a4   : > { %v918_v49 = vld [vmem:[#allocation5] sm:$0xff] }
 0x3f8   : > { %v924_v50 = vpop.permute.xlu0 %923 }
 0x3f9   : > { %v926_v51 = vmul.f32 %v924_v50, %v918_v49 }
 0x3fb   : > { %928 = vst.msk [vmem:[%s257_s22] sm:$0xff] %vm352_vm2, %v926_v51 }
 0x3fc   : > { %1227 = shalt.err (!%p1224_p5)
}
 0x3fd   : > { %s1228_s27 = scalar_lea.hbm %s942_s8, 128  ;;  %s1232_s14 = scalar_lea.hbm %s1519_s4, 256 }
 0x3fe   : > { %p1229_p6 = scmp.ne.s32.totalorder %s942_s8, %s1228_s27  ;;  %p1233_p4 = scmp.lt.s32.totalorder %s942_s8, %s1519_s4 }
 0x3ff   : > { %p1234_p13 = scmp.lt.s32.totalorder %s1232_s14, %s1228_s27 }
 0x400   : > { %p1230_p7 = pnand %p1229_p6, %p1379_p9 }
 0x401   : > { %p1235_p11 = por %p1234_p13, %p1233_p4 }
 0x402   : > { %p1231_p10 = pneg %p1230_p7 }
 0x404   : > { %p1236_p8 = pnand %p1235_p11, %p1231_p10 }
 0x406   : > { %1239 = shalt.err (!%p1236_p8)
}
 0x407   : > { %1113 = dma.vmem_to_hbm [thread:$0]  (%p1379_p9), %s945_s24, 128, %s942_s8, %s930_s10  }
 0x408 PF: > { %s956_s9 = sand.u32 1, %s1274_s15   ;;  %p1525_p12 = scmp.ne.s32.totalorder %s1523_s30, 0 }
 0x409   : > { %p1526_p0 = scmp.ge.s32.totalorder %s1294_s20, 2  ;;  %s957_s22 = scalar_lea.sflag [#allocation8], %s956_s9 }
 0x40b   : > { %p1120_p1 = pnand %p1526_p0, %p1525_p12 }
 0x40d   : > { %p1121_p2 = pneg %p1120_p1 }
 0x40f   : > { %1269 = dma.done.wait (%p1121_p2), %s957_s22, 128  }
 0x410   : > { %1271 = vsyncadd (%p1121_p2), %s957_s22, 4294967168  ;;  %s20_s20 = sadd.s32 1, %s1294_s20   ;;  %s1527_s15 = smov %s1278_s16 }
 0x411   : > { %p17_p3 = scmp.ge.s32.totalorder %s20_s20, 4   ;;  %s1528_s16 = smov %s1282_s17 }
 0x412   : > { %s1529_s17 = smov %s1384_s29  ;;  %s1530_s18 = smov %s1290_s19 }
 0x413   : > { %s1531_s19 = smov %s1533_s23  ;;  %19 = sbr.rel (!%p17_p3) target bundleno = 6 (0x6), region = 100 }
 0x418   :  { %962 = vsyncpa [#allocation7], 1 }
 0x419   :  { %964 = vsyncpa [#allocation7 + $0x1], 1 }
 0x41a   :  { %965 = vsyncpa [#allocation8], 1 }
 0x41b   :  { %967 = vsyncpa [#allocation8 + $0x1], 1 }

</bundles_post_ra>
